<compile_context>
chip_gen: v7x
topology: tpu7x:2x2x1
jax: 0.10.0
libtpu: 0.0.40
codegen_flags: <defaults>
</compile_context>

<pallas_src>
import functools

import jax
import jax.numpy as jnp
from jax.experimental import pallas as pl
from jax.experimental.pallas import tpu as pltpu


def _tv_kernel(x_ref, out_ref, *, cb, h, w):
    # x_ref block: (cb, H, W); out_ref block: (1, 1, W)
    row_last = jax.lax.broadcasted_iota(jnp.int32, (h, w), 0) == (h - 1)
    col_last = jax.lax.broadcasted_iota(jnp.int32, (h, w), 1) == (w - 1)

    acc = jnp.zeros((1, w), dtype=jnp.float32)
    for k in range(cb):  # static, small unroll (cb <= 8)
        x = x_ref[k].astype(jnp.float32)  # (H, W); cast folded into compute

        # roll semantics match jnp.roll: rolled[i] = x[(i+1) % n] for shift=n-1
        x_next_row = pltpu.roll(x, shift=h - 1, axis=0)  # sublane rotate (XLU)
        x_next_col = pltpu.roll(x, shift=w - 1, axis=1)  # lane rotate (XLU)

        dx = x_next_row - x  # valid rows    0 .. H-2 (last row wraps -> mask)
        dy = x_next_col - x  # valid columns 0 .. W-2 (last col wraps -> mask)

        tv = jnp.where(row_last, 0.0, jnp.abs(dx)) + jnp.where(
            col_last, 0.0, jnp.abs(dy)
        )
        # Reduce only over the sublane axis here; the cross-lane reduce happens
        # once, outside the kernel, on the tiny partials array.
        acc = acc + jnp.sum(tv, axis=0, keepdims=True)  # (1, W)

    out_ref[...] = acc.reshape(1, 1, w)


def _pick_channel_fold(nc, h, w, budget_bytes=1 << 20, max_fold=8):
    """Largest fold that divides NC, keeps block <= budget, and (when possible)
    leaves >= 2 grid steps for pipelining / megacore sharding."""
    best = 1
    for d in range(1, min(nc, max_fold) + 1):
        if nc % d:
            continue
        if d * h * w * 4 > budget_bytes:
            break
        if d != 1 and nc // d < 2:
            continue
        best = d
    return best


def loss_tv_forward(x, strength):
    """Mirrors LossTV.forward: returns `input` unchanged; also returns the
    loss (which the PyTorch module stashes in self.loss)."""
    n, c, h, w = x.shape
    nc = n * c
    xf = x.reshape(nc, h, w)  # free for contiguous NCHW; diffs never cross N/C

    cb = _pick_channel_fold(nc, h, w)
    num_blocks = nc // cb

    bytes_accessed = nc * h * w * x.dtype.itemsize + num_blocks * w * 4
    partials = pl.pallas_call(
        functools.partial(_tv_kernel, cb=cb, h=h, w=w),
        out_shape=jax.ShapeDtypeStruct((num_blocks, 1, w), jnp.float32),
        grid=(num_blocks,),
        in_specs=[pl.BlockSpec((cb, h, w), lambda i: (i, 0, 0))],
        out_specs=pl.BlockSpec((1, 1, w), lambda i: (i, 0, 0)),
        compiler_params=pltpu.CompilerParams(
            dimension_semantics=("parallel",),
        ),
        cost_estimate=pl.CostEstimate(
            flops=4 * nc * h * w,
            transcendentals=0,
            bytes_accessed=bytes_accessed,
        ),
    )(xf)

    # Final reduction over a few hundred scalars + strength scale: free in XLA.
    loss = jnp.float32(strength) * jnp.sum(partials)
    return x, loss


def loss_tv_reference(x, strength):
    xf = x.astype(jnp.float32)
    x_diff = xf[:, :, 1:, :] - xf[:, :, :-1, :]
    y_diff = xf[:, :, :, 1:] - xf[:, :, :, :-1]
    return strength * (jnp.sum(jnp.abs(x_diff)) + jnp.sum(jnp.abs(y_diff)))


if __name__ == "__main__":
    strength = 0.5  # deterministic constructor parameter (LossTV(strength))

    key = jax.random.PRNGKey(0)
    x = jax.random.normal(key, (2, 4, 16, 16), dtype=jnp.float32)  # NCHW

    out, loss = loss_tv_forward(x, strength)
    out = jax.block_until_ready(out)
    loss = jax.block_until_ready(loss)

    # correctness check vs. pure-JAX reference
    ref_loss = loss_tv_reference(x, strength)
    assert jnp.allclose(out, x), "forward must return input unchanged"
    assert jnp.allclose(loss, ref_loss, rtol=1e-5, atol=1e-5), (loss, ref_loss)

    print("KERNEL_OK")
</pallas_src>

<mosaic_0001>
module attributes {stable_mosaic.version = 11 : i64} {
  func.func @_tv_kernel(%arg0: i32, %arg1: memref<4x16x16xf32, #tpu.memory_space<vmem>>, %arg2: memref<1x1x16xf32, #tpu.memory_space<vmem>>) attributes {dimension_semantics = [#tpu.dimension_semantics<parallel>], iteration_bounds = array<i64: 2>, scalar_prefetch = 0 : i64, scratch_operands = 0 : i64, tpu.core_type = #tpu.core_type<tc>, window_params = [{transform_indices = @transform_0, window_bounds = array<i64: 4, 16, 16>}, {transform_indices = @transform_1, window_bounds = array<i64: 1, 1, 16>}]} {
    %0 = tpu.iota {dimensions = array<i32: 0>} : vector<16x16xi32>
    %c15_i32 = arith.constant 15 : i32
    %1 = vector.broadcast %c15_i32 : i32 to vector<16x16xi32>
    %2 = arith.cmpi eq, %0, %1 : vector<16x16xi32>
    %3 = tpu.iota {dimensions = array<i32: 1>} : vector<16x16xi32>
    %c15_i32_0 = arith.constant 15 : i32
    %4 = vector.broadcast %c15_i32_0 : i32 to vector<16x16xi32>
    %5 = arith.cmpi eq, %3, %4 : vector<16x16xi32>
    %cst = arith.constant 0.000000e+00 : f32
    %6 = vector.broadcast %cst : f32 to vector<1x16xf32>
    %c0 = arith.constant 0 : index
    %c0_1 = arith.constant 0 : index
    %c0_2 = arith.constant 0 : index
    %7 = vector.load %arg1[%c0, %c0_1, %c0_2] : memref<4x16x16xf32, #tpu.memory_space<vmem>>, vector<1x16x16xf32>
    %8 = vector.shape_cast %7 : vector<1x16x16xf32> to vector<16x16xf32>
    %c15_i32_3 = arith.constant 15 : i32
    %9 = tpu.dynamic_rotate %8 by %c15_i32_3 dim 0 : vector<16x16xf32>, i32 -> vector<16x16xf32>
    %c15_i32_4 = arith.constant 15 : i32
    %10 = tpu.dynamic_rotate %8 by %c15_i32_4 dim 1 : vector<16x16xf32>, i32 -> vector<16x16xf32>
    %11 = arith.subf %9, %8 : vector<16x16xf32>
    %12 = arith.subf %10, %8 : vector<16x16xf32>
    %13 = math.absf %11 : vector<16x16xf32>
    %cst_5 = arith.constant 0.000000e+00 : f32
    %14 = vector.broadcast %cst_5 : f32 to vector<16x16xf32>
    %15 = arith.select %2, %14, %13 : vector<16x16xi1>, vector<16x16xf32>
    %16 = math.absf %12 : vector<16x16xf32>
    %cst_6 = arith.constant 0.000000e+00 : f32
    %17 = vector.broadcast %cst_6 : f32 to vector<16x16xf32>
    %18 = arith.select %5, %17, %16 : vector<16x16xi1>, vector<16x16xf32>
    %19 = arith.addf %15, %18 : vector<16x16xf32>
    %cst_7 = arith.constant dense<0.000000e+00> : vector<16xf32>
    %20 = vector.multi_reduction <add>, %19, %cst_7 [0] : vector<16x16xf32> to vector<16xf32>
    %21 = vector.shape_cast %20 : vector<16xf32> to vector<1x16xf32>
    %22 = arith.addf %6, %21 : vector<1x16xf32>
    %c1 = arith.constant 1 : index
    %c0_8 = arith.constant 0 : index
    %c0_9 = arith.constant 0 : index
    %23 = vector.load %arg1[%c1, %c0_8, %c0_9] : memref<4x16x16xf32, #tpu.memory_space<vmem>>, vector<1x16x16xf32>
    %24 = vector.shape_cast %23 : vector<1x16x16xf32> to vector<16x16xf32>
    %c15_i32_10 = arith.constant 15 : i32
    %25 = tpu.dynamic_rotate %24 by %c15_i32_10 dim 0 : vector<16x16xf32>, i32 -> vector<16x16xf32>
    %c15_i32_11 = arith.constant 15 : i32
    %26 = tpu.dynamic_rotate %24 by %c15_i32_11 dim 1 : vector<16x16xf32>, i32 -> vector<16x16xf32>
    %27 = arith.subf %25, %24 : vector<16x16xf32>
    %28 = arith.subf %26, %24 : vector<16x16xf32>
    %29 = math.absf %27 : vector<16x16xf32>
    %cst_12 = arith.constant 0.000000e+00 : f32
    %30 = vector.broadcast %cst_12 : f32 to vector<16x16xf32>
    %31 = arith.select %2, %30, %29 : vector<16x16xi1>, vector<16x16xf32>
    %32 = math.absf %28 : vector<16x16xf32>
    %cst_13 = arith.constant 0.000000e+00 : f32
    %33 = vector.broadcast %cst_13 : f32 to vector<16x16xf32>
    %34 = arith.select %5, %33, %32 : vector<16x16xi1>, vector<16x16xf32>
    %35 = arith.addf %31, %34 : vector<16x16xf32>
    %cst_14 = arith.constant dense<0.000000e+00> : vector<16xf32>
    %36 = vector.multi_reduction <add>, %35, %cst_14 [0] : vector<16x16xf32> to vector<16xf32>
    %37 = vector.shape_cast %36 : vector<16xf32> to vector<1x16xf32>
    %38 = arith.addf %22, %37 : vector<1x16xf32>
    %c2 = arith.constant 2 : index
    %c0_15 = arith.constant 0 : index
    %c0_16 = arith.constant 0 : index
    %39 = vector.load %arg1[%c2, %c0_15, %c0_16] : memref<4x16x16xf32, #tpu.memory_space<vmem>>, vector<1x16x16xf32>
    %40 = vector.shape_cast %39 : vector<1x16x16xf32> to vector<16x16xf32>
    %c15_i32_17 = arith.constant 15 : i32
    %41 = tpu.dynamic_rotate %40 by %c15_i32_17 dim 0 : vector<16x16xf32>, i32 -> vector<16x16xf32>
    %c15_i32_18 = arith.constant 15 : i32
    %42 = tpu.dynamic_rotate %40 by %c15_i32_18 dim 1 : vector<16x16xf32>, i32 -> vector<16x16xf32>
    %43 = arith.subf %41, %40 : vector<16x16xf32>
    %44 = arith.subf %42, %40 : vector<16x16xf32>
    %45 = math.absf %43 : vector<16x16xf32>
    %cst_19 = arith.constant 0.000000e+00 : f32
    %46 = vector.broadcast %cst_19 : f32 to vector<16x16xf32>
    %47 = arith.select %2, %46, %45 : vector<16x16xi1>, vector<16x16xf32>
    %48 = math.absf %44 : vector<16x16xf32>
    %cst_20 = arith.constant 0.000000e+00 : f32
    %49 = vector.broadcast %cst_20 : f32 to vector<16x16xf32>
    %50 = arith.select %5, %49, %48 : vector<16x16xi1>, vector<16x16xf32>
    %51 = arith.addf %47, %50 : vector<16x16xf32>
    %cst_21 = arith.constant dense<0.000000e+00> : vector<16xf32>
    %52 = vector.multi_reduction <add>, %51, %cst_21 [0] : vector<16x16xf32> to vector<16xf32>
    %53 = vector.shape_cast %52 : vector<16xf32> to vector<1x16xf32>
    %54 = arith.addf %38, %53 : vector<1x16xf32>
    %c3 = arith.constant 3 : index
    %c0_22 = arith.constant 0 : index
    %c0_23 = arith.constant 0 : index
    %55 = vector.load %arg1[%c3, %c0_22, %c0_23] : memref<4x16x16xf32, #tpu.memory_space<vmem>>, vector<1x16x16xf32>
    %56 = vector.shape_cast %55 : vector<1x16x16xf32> to vector<16x16xf32>
    %c15_i32_24 = arith.constant 15 : i32
    %57 = tpu.dynamic_rotate %56 by %c15_i32_24 dim 0 : vector<16x16xf32>, i32 -> vector<16x16xf32>
    %c15_i32_25 = arith.constant 15 : i32
    %58 = tpu.dynamic_rotate %56 by %c15_i32_25 dim 1 : vector<16x16xf32>, i32 -> vector<16x16xf32>
    %59 = arith.subf %57, %56 : vector<16x16xf32>
    %60 = arith.subf %58, %56 : vector<16x16xf32>
    %61 = math.absf %59 : vector<16x16xf32>
    %cst_26 = arith.constant 0.000000e+00 : f32
    %62 = vector.broadcast %cst_26 : f32 to vector<16x16xf32>
    %63 = arith.select %2, %62, %61 : vector<16x16xi1>, vector<16x16xf32>
    %64 = math.absf %60 : vector<16x16xf32>
    %cst_27 = arith.constant 0.000000e+00 : f32
    %65 = vector.broadcast %cst_27 : f32 to vector<16x16xf32>
    %66 = arith.select %5, %65, %64 : vector<16x16xi1>, vector<16x16xf32>
    %67 = arith.addf %63, %66 : vector<16x16xf32>
    %cst_28 = arith.constant dense<0.000000e+00> : vector<16xf32>
    %68 = vector.multi_reduction <add>, %67, %cst_28 [0] : vector<16x16xf32> to vector<16xf32>
    %69 = vector.shape_cast %68 : vector<16xf32> to vector<1x16xf32>
    %70 = arith.addf %54, %69 : vector<1x16xf32>
    %71 = vector.shape_cast %70 : vector<1x16xf32> to vector<1x1x16xf32>
    %c0_29 = arith.constant 0 : index
    %c0_30 = arith.constant 0 : index
    %c0_31 = arith.constant 0 : index
    %72 = vector.load %arg2[%c0_29, %c0_30, %c0_31] : memref<1x1x16xf32, #tpu.memory_space<vmem>>, vector<1x1x16xf32>
    tpu.vector_store %arg2[%c0_29, %c0_30, %c0_31], %71 {strides = array<i32>} : memref<1x1x16xf32, #tpu.memory_space<vmem>>, vector<1x1x16xf32>,
    return
  }
  func.func @transform_0(%arg0: i32) -> (i32, i32, i32) {
    %c0_i32 = arith.constant 0 : i32
    %c0_i32_0 = arith.constant 0 : i32
    %c0_i32_1 = arith.constant 0 : i32
    return %arg0, %c0_i32, %c0_i32_0 : i32, i32, i32
  }
  func.func @transform_1(%arg0: i32) -> (i32, i32, i32) {
    %c0_i32 = arith.constant 0 : i32
    %c0_i32_0 = arith.constant 0 : i32
    %c0_i32_1 = arith.constant 0 : i32
    return %arg0, %c0_i32, %c0_i32_0 : i32, i32, i32
  }
}

</mosaic_0001>

<bundles_post_ra>
// kernel: tpu_custom_call.1
= control target key start
LH: loop header
LB: loop body
LE: loop exit
PB: predicated region body
PF: predicated region fallthrough
CT: control target
= control target key end

     0   :  { %6 = vsyncpa [#allocation3], 0  ;;  %s968_s0 = inlined_call_operand.hbm [shape: f32[8,16,16], index: 0, kind: input, shape index: {}]   ;;  %s969_s1 = inlined_call_operand.hbm [shape: f32[2,1,16], index: 1, kind: output, shape index: {}]  }
   0x1   :  { %8 = vsyncpa [#allocation3 + $0x1], 0 }
   0x2   :  { %9 = vsyncpa [#allocation4], 0 }
   0x3   :  { %11 = vsyncpa [#allocation4 + $0x1], 0  ;;  %s649_s6 = smov 0   ;;  %s651_s7 = smov 0  }
   0x4   :  { %s653_s8 = smov 0   ;;  %s655_s9 = smov 0  }
   0x5 LB: > { %s670_s10 = sadd.s32 4294967295, %s630_s9   ;;  %s463_s11 = sadd.s32 4294967294, %s630_s9   ;;  %s630_s9 = sphi %s655_s9, %s982_s9   ;;  %s626_s8 = sphi %s653_s8, %s981_s8   ;;  %s622_s7 = sphi %s651_s7, %s980_s7   ;;  %s618_s6 = sphi %s649_s6, %s979_s6  }
   0x6   : > { %s674_s12 = sadd.s32 1, %s630_s9   ;;  %s24_s13 = sadd.s32 1, %s626_s8 }
   0x7   : > { %s21_s14 = ssub.s32 %s630_s9, %s674_s12  ;;  %p31_p0 = scmp.ne.s32.totalorder %s626_s8, %s622_s7 }
   0x8   : > { %p22_p1 = scmp.eq.s32.totalorder %s21_s14, 0  ;;  %p32_p2 = scmp.eq.s32.totalorder %s630_s9, 0 }
   0x9   : > { %p37_p3 = scmp.ne.s32.totalorder %s622_s7, %s618_s6  ;;  %p38_p4 = scmp.eq.s32.totalorder %s670_s10, 0 }
   0xa   : > { %s686_s15 = scalar_select %p22_p1, %s626_s8, %s24_s13  }
   0xb   : > { %p688_p5 = por %p32_p2, %p31_p0  ;;  %p692_p6 = por %p38_p4, %p37_p3 }
   0xc   : > { %p61_p7 = scmp.eq.s32.totalorder %s670_s10, 1  ;;  %p67_p8 = scmp.eq.s32.totalorder %s463_s11, 1 }
   0xd   : > { %p495_p10 = scmp.lt.s32.totalorder %s630_s9, 2  ;;  %s87_s20 = sand.u32 1, %s626_s8  }
   0xe   : > { %p699_p11 = por %p61_p7, %p31_p0  ;;  %p703_p12 = por %p67_p8, %p37_p3 }
   0xf   : > { %s482_s21 = sshll.u32 %s630_s9, 10  ;;  %s466_s22 = sshll.u32 %s87_s20, 6 }
  0x10   : > { %s973_s18 = scalar_select %p699_p11, 1, 0 }
  0x11   : > { %s974_s19 = scalar_select %p703_p12, 1, 0 }
  0x12   : > { %s712_s25 = scalar_lea.hbm %s968_s0, %s482_s21  ;;  %s91_s26 = scalar_lea.vmem [#allocation2], %s466_s22 }
  0x13   : > { %s99_s27 = sshll.u32 %s91_s26, 4  ;;  %p716_p13 = pnand %p495_p10, %p688_p5  ;;  %s720_s27 = int_to_ptr.vmem [resolvable:$true] %s99_s27 }
  0x14   : > { %s722_s29 = scalar_lea.sflag [#allocation3], %s87_s20  ;;  %s534_s30 = scalar_lea.hbm %s712_s25, 1024 }
  0x15   : > { %p535_p0 = scmp.ne.s32.totalorder %s712_s25, %s534_s30  ;;  %p536_p1 = pneg %p716_p13 }
  0x16   : > { %s539_s4 = scalar_lea.hbm %s968_s0, 2048  ;;  %p540_p4 = scmp.lt.u32.totalorder %s712_s25, %s968_s0 }
  0x17   : > { %p537_p2 = pnand %p536_p1, %p535_p0  ;;  %p541_p5 = scmp.lt.u32.totalorder %s539_s4, %s534_s30 }
  0x18   : > { %p543_p8 = scmp.lt.u32.totalorder %s534_s30, %s712_s25 }
  0x19   : > { %p538_p3 = pneg %p537_p2  ;;  %p542_p7 = por %p541_p5, %p540_p4 }
  0x1b   : > { %p544_p10 = por %p543_p8, %p542_p7 }
  0x1d   : > { %p545_p9 = pnand %p544_p10, %p538_p3 }
  0x1f   : > { %548 = shalt.err (!%p545_p9)
}
  0x20   : > { %s549_s13 = scalar_lea.vmem %s720_s27, 1024  ;;  %s632_s14 = smov [#allocation2]  }
  0x21   : > { %p550_p0 = scmp.ne.s32.totalorder %s720_s27, %s549_s13  ;;  %s554_s16 = sshll.u32 %s632_s14, 4  ;;  %s555_s16 = int_to_ptr.vmem [resolvable:$false] %s554_s16 }
  0x22   : > { %s556_s20 = scalar_lea.vmem %s555_s16, 2048  ;;  %p557_p11 = scmp.lt.s32.totalorder %s720_s27, %s555_s16 }
  0x23   : > { %p552_p2 = pnand %p550_p0, %p536_p1  ;;  %p558_p4 = scmp.lt.s32.totalorder %s556_s20, %s549_s13 }
  0x25   : > { %p553_p12 = pneg %p552_p2  ;;  %p559_p5 = por %p558_p4, %p557_p11 }
  0x27   : > { %p560_p7 = pnand %p559_p5, %p553_p12 }
  0x29   : > { %563 = shalt.err (!%p560_p7)
}
  0x2a   : > { %s633_s21 = smov 128   ;;  %s634_s22 = smov 8  }
  0x2b   : > { %490 = dma.hbm_to_vmem [thread:$0]  (!%p716_p13), %s712_s25, 1024, %s720_s27, %s722_s29, %s633_s21, %s633_s21, %s634_s22  }
  0x2c   : > { %p470_p9 = scmp.ge.s32.totalorder %s630_s9, 1  ;;  %p107_p1 = scmp.lt.s32.totalorder %s630_s9, 3 }
  0x2e   : > { %p108_p3 = pnand %p470_p9, %p107_p1 }
  0x2f   : > { %s753_s23 = sand.u32 (!%p108_p3), 1, %s622_s7  }
  0x30   : > { %111 = sbr.rel (%p108_p3) target bundleno = 461 (0x1cd), region = 24  ;;  %s471_s24 = sshll.u32 (!%p108_p3), %s753_s23, 6 }
  0x31   : > { %s114_s26 = scalar_lea.sflag (!%p108_p3), [#allocation3], %s753_s23  ;;  %s117_s30 = scalar_lea.vmem (!%p108_p3), [#allocation2], %s471_s24 }
  0x37   : > { %609 = dma.done.wait (%p692_p6), %s114_s26, 1024  }
  0x38   : > { %611 = vsyncadd (%p692_p6), %s114_s26, 4294966272  ;;  %v761_v0 = vld [vmem:[%s117_s30] sm:$0xff]  ;;  %v763_v1 = vld [vmem:[%s117_s30 + $0x10] sm:$0xff]  ;;  %s635_s25 = smov 16   ;;  %s636_s17 = smov 1   ;;  %vm151_vm0 = vcmask 1047680  }
  0x39   : > { %152 = vrot.lane.b32.xlu0 %v761_v0, %s635_s25  ;;  %212 = vrot.lane.b32.xlu1 %v763_v1, %s635_s25  ;;  %v769_v2 = vld [vmem:[%s117_s30 + $0x8] sm:$0xff]  ;;  %v771_v3 = vld [vmem:[%s117_s30 + $0x18] sm:$0xff]  ;;  %s637_s27 = smov 127   ;;  %vm194_vm4 = vcmask 130048   ;;  %s478_s28 = sshll.u32 %s670_s10, 4  ;;  %vm382_vm5 = vcmask 122880  }
  0x3a   : > { %v777_v4 = vld [vmem:[%s117_s30 + $0x20] sm:$0xff]  ;;  %v779_v5 = vld [vmem:[%s117_s30 + $0x28] sm:$0xff]  ;;  %v785_v6 = vld [vmem:[%s117_s30 + $0x30] sm:$0xff]  ;;  %s134_s29 = scalar_lea.vmem [#allocation5], %s753_s23  ;;  %s924_s5 = scalar_lea.hbm %s969_s1, %s478_s28 }
  0x3b   : > { %v787_v7 = vld [vmem:[%s117_s30 + $0x38] sm:$0xff]  ;;  %s397_s2 = sshll.u32 %s134_s29, 4  ;;  %s385_s11 = scalar_lea.sflag [#allocation4], %s753_s23  ;;  %s926_s2 = int_to_ptr.vmem [resolvable:$true] %s397_s2 }
  0x3c   : > { %s564_s13 = scalar_lea.vmem %s926_s2, 16  ;;  %p976_p11 = scmp.ne.s32.totalorder %s973_s18, 0 }
  0x3d   : > { %155 = vrot.lane.b32.xlu0 %v769_v2, %s635_s25  ;;  %215 = vrot.lane.b32.xlu1 %v771_v3, %s635_s25  ;;  %p565_p6 = scmp.ne.s32.totalorder %s926_s2, %s564_s13  ;;  %s638_s10 = smov [#allocation5]  }
  0x3e   : > { %s568_s14 = sshll.u32 %s638_s10, 4  ;;  %s569_s14 = int_to_ptr.vmem [resolvable:$false] %s568_s14 }
  0x3f   : > { %p566_p12 = pnand %p565_p6, %p976_p11  ;;  %s570_s16 = scalar_lea.vmem %s569_s14, 32 }
  0x40   : > { %p571_p8 = scmp.lt.s32.totalorder %s926_s2, %s569_s14  ;;  %p572_p10 = scmp.lt.s32.totalorder %s570_s16, %s564_s13 }
  0x41   : > { %271 = vrot.lane.b32.xlu0 %v777_v4, %s635_s25  ;;  %274 = vrot.lane.b32.xlu1 %v779_v5, %s635_s25  ;;  %p567_p13 = pneg %p566_p12 }
  0x42   : > { %p573_p0 = por %p572_p10, %p571_p8 }
  0x44   : > { %p574_p2 = pnand %p573_p0, %p567_p13 }
  0x45   : > { %330 = vrot.lane.b32.xlu0 %v785_v6, %s635_s25  ;;  %333 = vrot.lane.b32.xlu1 %v787_v7, %s635_s25 }
  0x49   : > { %168 = vrot.lane.b32.xlu0 %v761_v0, %s636_s17  ;;  %170 = vrot.lane.b32.xlu1 %v769_v2, %s636_s17 }
  0x4d   : > { %228 = vrot.lane.b32.xlu0 %v763_v1, %s636_s17  ;;  %230 = vrot.lane.b32.xlu1 %v771_v3, %s636_s17 }
  0x51   : > { %287 = vrot.lane.b32.xlu0 %v777_v4, %s636_s17  ;;  %289 = vrot.lane.b32.xlu1 %v779_v5, %s636_s17 }
  0xab   : > { %v153_v8 = vpop.permute.xlu0 %152  ;;  %v213_v9 = vpop.permute.xlu1 %212 }
  0xac   : > { %v154_v10 = vsel %vm151_vm0, %v153_v8, %v761_v0  ;;  %v214_v11 = vsel %vm151_vm0, %v213_v9, %v763_v1  ;;  %v136_v8 = vlaneseq }
  0xad   : > { %158 = vrot.lane.b32.xlu0 %v154_v10, %s635_s25  ;;  %v147_v10 = vrot.slane %v769_v2, 1 }
  0xae   : > { %v137_v9 = vshrl.u32 %v136_v8, 7 }
  0xaf   : > { %v156_v12 = vpop.permute.xlu0 %155  ;;  %v216_v13 = vpop.permute.xlu1 %215 }
  0xb0   : > { %v157_v14 = vsel %vm151_vm0, %v156_v12, %v769_v2  ;;  %v217_v15 = vsel %vm151_vm0, %v216_v13, %v771_v3  ;;  %vm148_vm1 = vcmp.lt.s32.totalorder %v137_v9, 7 }
  0xb1   : > { %218 = vrot.lane.b32.xlu0 %v214_v11, %s635_s25  ;;  %160 = vrot.lane.b32.xlu1 %v157_v14, %s635_s25  ;;  %v146_v11 = vrot.slane %v761_v0, 1  ;;  %v208_v14 = vrot.slane %v763_v1, 1 }
  0xb3   : > { %v272_v16 = vpop.permute.xlu0 %271  ;;  %v275_v17 = vpop.permute.xlu1 %274  ;;  %v149_v12 = vsel %vm148_vm1, %v146_v11, %v147_v10  ;;  %v150_v13 = vsel %vm148_vm1, %v147_v10, %v146_v11 }
  0xb4   : > { %v273_v18 = vsel %vm151_vm0, %v272_v16, %v777_v4  ;;  %v276_v19 = vsel %vm151_vm0, %v275_v17, %v779_v5  ;;  %v863_v16 = vand.u32 127, %v136_v8  ;;  %v164_v17 = vsub.f32 %v149_v12, %v761_v0 }
  0xb5   : > { %220 = vrot.lane.b32.xlu1 %v217_v15, %s635_s25  ;;  %277 = vrot.lane.b32.xlu0 %v273_v18, %s635_s25  ;;  %v209_v15 = vrot.slane %v771_v3, 1  ;;  %v165_v18 = vsub.f32 %v150_v13, %v769_v2 }
  0xb6   : > { %vm143_vm2 = vcmp.eq.s32.totalorder %v863_v16, 15 }
  0xb7   : > { %v331_v20 = vpop.permute.xlu0 %330  ;;  %v334_v21 = vpop.permute.xlu1 %333 }
  0xb8   : > { %v332_v22 = vsel %vm151_vm0, %v331_v20, %v785_v6  ;;  %v335_v23 = vsel %vm151_vm0, %v334_v21, %v787_v7  ;;  %v211_v20 = vsel %vm148_vm1, %v209_v15, %v208_v14  ;;  %v267_v21 = vrot.slane %v777_v4, 1 }
  0xb9   : > { %279 = vrot.lane.b32.xlu1 %v276_v19, %s635_s25  ;;  %336 = vrot.lane.b32.xlu0 %v332_v22, %s635_s25  ;;  %v867_v19 = vadd.s32 8, %v137_v9  ;;  %v268_v22 = vrot.slane %v779_v5, 1 }
  0xbb   : > { %v169_v24 = vpop.permute.xlu0 %168  ;;  %v171_v25 = vpop.permute.xlu1 %170  ;;  %vm140_vm3 = vcmp.eq.s32.totalorder %v867_v19, 15 }
  0xbd   : > { %338 = vrot.lane.b32.xlu1 %v335_v23, %s635_s25  ;;  %346 = vrot.lane.b32.xlu0 %v785_v6, %s636_s17  ;;  %v210_v23 = vsel %vm148_vm1, %v208_v14, %v209_v15 }
  0xbf   : > { %v229_v26 = vpop.permute.xlu0 %228  ;;  %v231_v27 = vpop.permute.xlu1 %230 }
  0xc1   : > { %348 = vrot.lane.b32.xlu1 %v787_v7, %s636_s17 }
  0xc3   : > { %v288_v28 = vpop.permute.xlu0 %287  ;;  %v290_v29 = vpop.permute.xlu1 %289 }
 0x11f   : > { %v159_v30 = vpop.permute.xlu0 %158 }
 0x120   : > { %v162_v31 = vsel %vm151_vm0, %v159_v30, %v761_v0  ;;  %v224_v0 = vsub.f32 %v210_v23, %v763_v1 }
 0x121   : > { %v174_v32 = vsub.f32 %v162_v31, %v169_v24  ;;  %v176_v24 = vand.u32 2147483647, %v164_v17 }
 0x123   : > { %v180_v33 = vand.u32 2147483647, %v174_v32  ;;  %v161_v34 = vpop.permute.xlu1 %160  ;;  %v219_v35 = vpop.permute.xlu0 %218 }
 0x124   : > { %v163_v36 = vsel %vm151_vm0, %v161_v34, %v769_v2  ;;  %v222_v37 = vsel %vm151_vm0, %v219_v35, %v763_v1  ;;  %v269_v2 = vsel %vm148_vm1, %v267_v21, %v268_v22  ;;  %v236_v35 = vand.u32 2147483647, %v224_v0 }
 0x125   : > { %v175_v38 = vsub.f32 %v163_v36, %v171_v25  ;;  %v234_v39 = vsub.f32 %v222_v37, %v229_v26  ;;  %184 = vrot.lane.b32.xlu0 %v180_v33, %s637_s27  ;;  %v177_v25 = vand.u32 2147483647, %v165_v18  ;;  %v225_v26 = vsub.f32 %v211_v20, %v771_v3 }
 0x126   : > { %v283_v32 = vsub.f32 %v269_v2, %v777_v4  ;;  %v326_v1 = vrot.slane %v785_v6, 1  ;;  %v327_v37 = vrot.slane %v787_v7, 1 }
 0x127   : > { %v181_v40 = vand.u32 2147483647, %v175_v38  ;;  %v240_v41 = vand.u32 2147483647, %v234_v39  ;;  %v221_v42 = vpop.permute.xlu1 %220  ;;  %v278_v43 = vpop.permute.xlu0 %277  ;;  %v179_v30 = vsel %vm140_vm3, 0.0, %v177_v25 }
 0x128   : > { %v223_v44 = vsel %vm151_vm0, %v221_v42, %v771_v3  ;;  %v281_v45 = vsel %vm151_vm0, %v278_v43, %v777_v4  ;;  %v237_v31 = vand.u32 2147483647, %v225_v26  ;;  %v329_v42 = vsel %vm148_vm1, %v327_v37, %v326_v1 }
 0x129   : > { %v235_v46 = vsub.f32 %v223_v44, %v231_v27  ;;  %v293_v47 = vsub.f32 %v281_v45, %v288_v28  ;;  %186 = vrot.lane.b32.xlu1 %v181_v40, %s637_s27  ;;  %244 = vrot.lane.b32.xlu0 %v240_v41, %s637_s27  ;;  %v270_v28 = vsel %vm148_vm1, %v268_v22, %v267_v21 }
 0x12a   : > { %v284_v3 = vsub.f32 %v270_v28, %v779_v5  ;;  %v239_v4 = vsel %vm140_vm3, 0.0, %v237_v31 }
 0x12b   : > { %v241_v48 = vand.u32 2147483647, %v235_v46  ;;  %v299_v49 = vand.u32 2147483647, %v293_v47  ;;  %v280_v50 = vpop.permute.xlu1 %279  ;;  %v337_v51 = vpop.permute.xlu0 %336 }
 0x12c   : > { %v282_v52 = vsel %vm151_vm0, %v280_v50, %v779_v5  ;;  %v340_v54 = vsel %vm151_vm0, %v337_v51, %v785_v6  ;;  %v295_v5 = vand.u32 2147483647, %v283_v32  ;;  %v296_v41 = vand.u32 2147483647, %v284_v3 }
 0x12d   : > { %v294_v53 = vsub.f32 %v282_v52, %v290_v29  ;;  %246 = vrot.lane.b32.xlu1 %v241_v48, %s637_s27  ;;  %303 = vrot.lane.b32.xlu0 %v299_v49, %s637_s27  ;;  %v328_v48 = vsel %vm148_vm1, %v326_v1, %v327_v37 }
 0x12f   : > { %v300_v55 = vand.u32 2147483647, %v294_v53  ;;  %v339_v56 = vpop.permute.xlu1 %338  ;;  %v347_v57 = vpop.permute.xlu0 %346  ;;  %v343_v53 = vsub.f32 %v329_v42, %v787_v7 }
 0x130   : > { %v352_v58 = vsub.f32 %v340_v54, %v347_v57  ;;  %v341_v60 = vsel %vm151_vm0, %v339_v56, %v787_v7  ;;  %v298_v54 = vsel %vm140_vm3, 0.0, %v296_v41 }
 0x131   : > { %305 = vrot.lane.b32.xlu1 %v300_v55, %s637_s27  ;;  %v342_v55 = vsub.f32 %v328_v48, %v785_v6  ;;  %v355_v8 = vand.u32 2147483647, %v343_v53 }
 0x132   : > { %v358_v59 = vand.u32 2147483647, %v352_v58 }
 0x133   : > { %v349_v61 = vpop.permute.xlu1 %348  ;;  %v354_v7 = vand.u32 2147483647, %v342_v55  ;;  %v357_v17 = vsel %vm140_vm3, 0.0, %v355_v8 }
 0x134   : > { %v353_v62 = vsub.f32 %v341_v60, %v349_v61  ;;  %362 = vrot.lane.b32.xlu0 %v358_v59, %s637_s27 }
 0x136   : > { %v359_v63 = vand.u32 2147483647, %v353_v62 }
 0x138   : > { %364 = vrot.lane.b32.xlu1 %v359_v63, %s637_s27 }
 0x197   : > { %v185_v27 = vpop.permute.xlu0 %184 }
 0x198   : > { %v190_v29 = vsel %vm143_vm2, 0.0, %v185_v27 }
 0x199   : > { %v192_v33 = vadd.f32 %v190_v29, %v176_v24 }
 0x19b   : > { %v187_v34 = vpop.permute.xlu1 %186  ;;  %v245_v36 = vpop.permute.xlu0 %244  ;;  %v195_v43 = vsel %vm194_vm4, %v192_v33, 0.0 }
 0x19c   : > { %v191_v38 = vsel %vm143_vm2, 0.0, %v187_v34  ;;  %v250_v39 = vsel %vm143_vm2, 0.0, %v245_v36 }
 0x19d   : > { %v193_v40 = vadd.f32 %v191_v38, %v179_v30  ;;  %v252_v45 = vadd.f32 %v250_v39, %v236_v35 }
 0x19f   : > { %v196_v44 = vsel %vm194_vm4, %v193_v40, 0.0  ;;  %v247_v46 = vpop.permute.xlu1 %246  ;;  %v304_v47 = vpop.permute.xlu0 %303  ;;  %v254_v57 = vsel %vm194_vm4, %v252_v45, 0.0 }
 0x1a0   : > { %v197_v49 = vadd.f32 %v196_v44, %v195_v43  ;;  %v251_v50 = vsel %vm143_vm2, 0.0, %v247_v46  ;;  %v309_v51 = vsel %vm143_vm2, 0.0, %v304_v47 }
 0x1a1   : > { %v253_v52 = vadd.f32 %v251_v50, %v239_v4  ;;  %v311_v59 = vadd.f32 %v309_v51, %v295_v5 }
 0x1a2   : > { %v198_v56 = vrot.slane %v197_v49, 4 }
 0x1a3   : > { %v255_v58 = vsel %vm194_vm4, %v253_v52, 0.0  ;;  %v306_v60 = vpop.permute.xlu1 %305  ;;  %v313_v12 = vsel %vm194_vm4, %v311_v59, 0.0 }
 0x1a4   : > { %v256_v61 = vadd.f32 %v255_v58, %v254_v57  ;;  %v310_v62 = vsel %vm143_vm2, 0.0, %v306_v60  ;;  %v199_v11 = vadd.f32 %v198_v56, %v197_v49 }
 0x1a5   : > { %v312_v63 = vadd.f32 %v310_v62, %v298_v54 }
 0x1a6   : > { %v257_v9 = vrot.slane %v256_v61, 4  ;;  %v363_v10 = vpop.permute.xlu0 %362  ;;  %v200_v23 = vrot.slane %v199_v11, 2 }
 0x1a7   : > { %v314_v6 = vsel %vm194_vm4, %v312_v63, 0.0  ;;  %v368_v13 = vsel %vm143_vm2, 0.0, %v363_v10 }
 0x1a8   : > { %v258_v14 = vadd.f32 %v257_v9, %v256_v61  ;;  %v315_v15 = vadd.f32 %v314_v6, %v313_v12  ;;  %v370_v21 = vadd.f32 %v368_v13, %v354_v7  ;;  %v201_v29 = vadd.f32 %v200_v23, %v199_v11 }
 0x1aa   : > { %v259_v18 = vrot.slane %v258_v14, 2  ;;  %v316_v20 = vrot.slane %v315_v15, 4  ;;  %v365_v22 = vpop.permute.xlu1 %364  ;;  %v372_v2 = vsel %vm194_vm4, %v370_v21, 0.0  ;;  %v202_v3 = vrot.slane %v201_v29, 1 }
 0x1ab   : > { %v369_v24 = vsel %vm143_vm2, 0.0, %v365_v22 }
 0x1ac   : > { %v317_v25 = vadd.f32 %v316_v20, %v315_v15  ;;  %v371_v26 = vadd.f32 %v369_v24, %v357_v17  ;;  %v260_v27 = vadd.f32 %v259_v18, %v258_v14  ;;  %v203_v36 = vadd.f32 %v202_v3, %v201_v29 }
 0x1ae   : > { %v318_v0 = vrot.slane %v317_v25, 2  ;;  %v373_v28 = vsel %vm194_vm4, %v371_v26, 0.0  ;;  %v261_v31 = vrot.slane %v260_v27, 1 }
 0x1af   : > { %v374_v19 = vadd.f32 %v373_v28, %v372_v2 }
 0x1b0   : > { %v319_v30 = vadd.f32 %v318_v0, %v317_v25  ;;  %v262_v16 = vadd.f32 %v261_v31, %v260_v27 }
 0x1b1   : > { %v375_v32 = vrot.slane %v374_v19, 4 }
 0x1b2   : > { %v320_v33 = vrot.slane %v319_v30, 1  ;;  %v263_v38 = vadd.f32 %v262_v16, %v203_v36 }
 0x1b3   : > { %v376_v34 = vadd.f32 %v375_v32, %v374_v19 }
 0x1b4   : > { %v321_v1 = vadd.f32 %v320_v33, %v319_v30 }
 0x1b5   : > { %v377_v35 = vrot.slane %v376_v34, 2 }
 0x1b6   : > { %v322_v40 = vadd.f32 %v321_v1, %v263_v38 }
 0x1b7   : > { %v378_v37 = vadd.f32 %v377_v35, %v376_v34 }
 0x1b9   : > { %v379_v39 = vrot.slane %v378_v37, 1 }
 0x1bb   : > { %v380_v4 = vadd.f32 %v379_v39, %v378_v37 }
 0x1bd   : > { %v381_v5 = vadd.f32 %v380_v4, %v322_v40 }
 0x1bf   : > { %383 = vst.msk [vmem:[%s134_s29] sm:$0x1] %vm382_vm5, %v381_v5 }
 0x1c0   : > { %577 = shalt.err (!%p574_p2)
}
 0x1c1   : > { %s578_s20 = scalar_lea.hbm %s924_s5, 16  ;;  %s582_s23 = scalar_lea.hbm %s969_s1, 32 }
 0x1c2   : > { %p579_p4 = scmp.ne.s32.totalorder %s924_s5, %s578_s20  ;;  %p583_p9 = scmp.lt.u32.totalorder %s924_s5, %s969_s1 }
 0x1c3   : > { %p584_p1 = scmp.lt.u32.totalorder %s582_s23, %s578_s20  ;;  %p586_p6 = scmp.lt.u32.totalorder %s578_s20, %s924_s5 }
 0x1c4   : > { %p580_p5 = pnand %p579_p4, %p976_p11 }
 0x1c5   : > { %p585_p3 = por %p584_p1, %p583_p9 }
 0x1c6   : > { %p581_p7 = pneg %p580_p5 }
 0x1c7   : > { %p587_p12 = por %p586_p6, %p585_p3 }
 0x1c9   : > { %p588_p13 = pnand %p587_p12, %p581_p7 }
 0x1cb   : > { %591 = shalt.err (!%p588_p13)
}
 0x1cc   : > { %485 = dma.vmem_to_hbm [thread:$0]  (%p976_p11), %s926_s2, 16, %s924_s5, %s385_s11  }
 0x1cd PF: > { %s409_s30 = sand.u32 1, %s618_s6   ;;  %p977_p8 = scmp.ne.s32.totalorder %s974_s19, 0 }
 0x1ce   : > { %p978_p10 = scmp.ge.s32.totalorder %s630_s9, 2  ;;  %s410_s25 = scalar_lea.sflag [#allocation4], %s409_s30 }
 0x1d0   : > { %p492_p0 = pnand %p978_p10, %p977_p8 }
 0x1d2   : > { %613 = dma.done.wait (!%p492_p0), %s410_s25, 16  }
 0x1d3   : > { %615 = vsyncadd (!%p492_p0), %s410_s25, 4294967280  ;;  %p14_p2 = scmp.ge.s32.totalorder %s674_s12, 4   ;;  %s979_s6 = smov %s622_s7 }
 0x1d4   : > { %s980_s7 = smov %s626_s8  ;;  %s981_s8 = smov %s686_s15 }
 0x1d5   : > { %s982_s9 = smov %s674_s12  ;;  %16 = sbr.rel (!%p14_p2) target bundleno = 5 (0x5), region = 72 }
 0x1dc   :  { %414 = vsyncpa [#allocation3], 1 }
 0x1dd   :  { %416 = vsyncpa [#allocation3 + $0x1], 1 }
 0x1de   :  { %417 = vsyncpa [#allocation4], 1 }
 0x1df   :  { %419 = vsyncpa [#allocation4 + $0x1], 1 }

</bundles_post_ra>
